<compile_context>
chip_gen: v7x
topology: tpu7x:2x2x1
jax: 0.10.0
libtpu: 0.0.40
codegen_flags: <defaults>
</compile_context>

<pallas_src>
import functools
import math

import jax
import jax.numpy as jnp
from jax.experimental import pallas as pl
from jax.experimental.pallas import tpu as pltpu


_LANE = 128
_FUSED_MAX_NODES = 1024                    # whole problem resident in VMEM below this
_VMEM_LIMIT_BYTES = 32 * 1024 * 1024       # safe on v5e (128 MiB) / v6e (128) / v7x (64)


def _round_up(x, m):
    return (x + m - 1) // m * m


# ---------------------------------------------------------------------------
# Fused path: adjacency + embeddings resident in VMEM, all layers in one call.
# ---------------------------------------------------------------------------
def _fused_lightgcn_kernel(a_ref, e0_ref, out_ref, *, num_layers):
    a = a_ref[...]                                  # bf16 [n_pad, n_pad]
    e = e0_ref[...]                                 # f32  [n_pad, d_pad]
    acc = e
    for _ in range(num_layers):                     # compile-time unrolled
        e = jnp.dot(a, e.astype(jnp.bfloat16),
                    preferred_element_type=jnp.float32)
        acc = acc + e
    out_ref[...] = acc / float(num_layers + 1)


def _fused_forward(adj_bf16, emb0, num_layers):
    n_pad, d_pad = emb0.shape
    flops = 2 * num_layers * n_pad * n_pad * d_pad
    bytes_accessed = adj_bf16.size * 2 + emb0.size * 4 * 2
    return pl.pallas_call(
        functools.partial(_fused_lightgcn_kernel, num_layers=num_layers),
        out_shape=jax.ShapeDtypeStruct((n_pad, d_pad), jnp.float32),
        grid=(1,),
        in_specs=[
            pl.BlockSpec((n_pad, n_pad), lambda i: (0, 0)),
            pl.BlockSpec((n_pad, d_pad), lambda i: (0, 0)),
        ],
        out_specs=pl.BlockSpec((n_pad, d_pad), lambda i: (0, 0)),
        compiler_params=pltpu.CompilerParams(
            dimension_semantics=("arbitrary",),
            vmem_limit_bytes=_VMEM_LIMIT_BYTES),
        cost_estimate=pl.CostEstimate(
            flops=flops, transcendentals=0, bytes_accessed=bytes_accessed),
    )(adj_bf16, emb0)


# ---------------------------------------------------------------------------
# Tiled path: per-layer streamed-A matmul with fused next-operand + layer sum.
# ---------------------------------------------------------------------------
def _layer_kernel(a_ref, e_ref, sum_in_ref, e_new_ref, sum_out_ref, acc_ref):
    k = pl.program_id(1)

    @pl.when(k == 0)
    def _():
        acc_ref[...] = jnp.zeros_like(acc_ref)

    acc_ref[...] += jnp.dot(a_ref[...], e_ref[...],
                            preferred_element_type=jnp.float32)

    @pl.when(k == pl.num_programs(1) - 1)
    def _():
        e_new_ref[...] = acc_ref[...].astype(e_new_ref.dtype)   # next layer operand
        sum_out_ref[...] = sum_in_ref[...] + acc_ref[...]       # running layer sum


def _propagate_layer(adj_bf16, e_bf16, emb_sum, tile_m, tile_k):
    """One LightGCN layer: returns (bf16 E_new, f32 emb_sum + E_new)."""
    n_pad, d_pad = e_bf16.shape
    grid = (n_pad // tile_m, n_pad // tile_k)

    flops = 2 * n_pad * n_pad * d_pad
    bytes_accessed = (adj_bf16.size * 2                 # A streamed once (bf16)
                      + e_bf16.size * 2 * grid[0]       # E re-read per row tile
                      + emb_sum.size * 4 * 2            # sum read + write (f32)
                      + n_pad * d_pad * 2)              # bf16 E_new write

    return pl.pallas_call(
        _layer_kernel,
        out_shape=(jax.ShapeDtypeStruct((n_pad, d_pad), jnp.bfloat16),
                   jax.ShapeDtypeStruct((n_pad, d_pad), jnp.float32)),
        grid=grid,
        in_specs=[
            pl.BlockSpec((tile_m, tile_k), lambda i, k: (i, k)),
            pl.BlockSpec((tile_k, d_pad), lambda i, k: (k, 0)),
            pl.BlockSpec((tile_m, d_pad), lambda i, k: (i, 0)),
        ],
        out_specs=(
            pl.BlockSpec((tile_m, d_pad), lambda i, k: (i, 0)),
            pl.BlockSpec((tile_m, d_pad), lambda i, k: (i, 0)),
        ),
        scratch_shapes=[pltpu.VMEM((tile_m, d_pad), jnp.float32)],
        input_output_aliases={2: 1},          # emb_sum updated in place
        compiler_params=pltpu.CompilerParams(
            dimension_semantics=("parallel", "arbitrary"),
            vmem_limit_bytes=_VMEM_LIMIT_BYTES),
        cost_estimate=pl.CostEstimate(
            flops=flops, transcendentals=0, bytes_accessed=bytes_accessed),
    )(adj_bf16, e_bf16, emb_sum)


# ---------------------------------------------------------------------------
# Forward wrapper (padded forward is jitted; adjacency prep is hoistable).
# ---------------------------------------------------------------------------
@functools.partial(jax.jit, static_argnames=(
    "num_layers", "num_users", "num_items", "num_nodes", "emb_dim",
    "tile_m", "tile_k"))
def _lightgcn_padded_forward(adj_bf16, emb0, *, num_layers, num_users,
                             num_items, num_nodes, emb_dim, tile_m, tile_k):
    if tile_m is None:                       # fused: all layers in one call
        final_padded = _fused_forward(adj_bf16, emb0, num_layers)
    else:                                    # tiled: one call per layer
        e = emb0.astype(jnp.bfloat16)
        emb_sum = emb0
        for _ in range(num_layers):
            e, emb_sum = _propagate_layer(adj_bf16, e, emb_sum, tile_m, tile_k)
        final_padded = emb_sum / float(num_layers + 1)
    final = final_padded[:num_nodes, :emb_dim]
    return final[:num_users], final[num_users:num_users + num_items]


def prepare_adjacency(norm_adj, n_pad):
    """Pad + cast the dense normalized adjacency to bf16.
    Hoist and reuse across forward calls: it is the only O(N^2) rewrite."""
    n = norm_adj.shape[0]
    adj = jnp.zeros((n_pad, n_pad), jnp.bfloat16)
    return adj.at[:n, :n].set(norm_adj.astype(jnp.bfloat16))


def _prepare_embeddings(user_emb, item_emb, n_pad, d_pad):
    all_emb = jnp.concatenate([user_emb, item_emb], axis=0).astype(jnp.float32)
    emb0 = jnp.zeros((n_pad, d_pad), jnp.float32)
    return emb0.at[:all_emb.shape[0], :all_emb.shape[1]].set(all_emb)


def _choose_layout(num_nodes, tile_m, tile_k):
    """Returns (n_pad, tile_m, tile_k); tile_m=None selects the fused path."""
    if tile_m is None and tile_k is None and num_nodes <= _FUSED_MAX_NODES:
        return _round_up(num_nodes, _LANE), None, None
    tm = 1024 if tile_m is None else tile_m
    tk = 2048 if tile_k is None else tile_k
    # n_pad must be a multiple of both tiles; 2*tm keeps grid[0] even so the
    # "parallel" row axis feeds both v7x TensorCores.
    return _round_up(num_nodes, math.lcm(2 * tm, tk)), tm, tk


def lightgcn_forward(norm_adj, user_emb, item_emb, num_layers, dropout=0.0,
                     *, tile_m=None, tile_k=None):
    """Matches LightGCN.forward: mean of E^(0..L) with E^(l+1) = A_norm E^(l)."""
    if dropout:
        # TODO(synk): dropout > 0 between layers is not implemented.
        raise NotImplementedError("dropout > 0 is not supported")
    num_users, emb_dim = user_emb.shape
    num_items = item_emb.shape[0]
    num_nodes = num_users + num_items
    d_pad = _round_up(emb_dim, _LANE)

    n_pad, tm, tk = _choose_layout(num_nodes, tile_m, tile_k)
    adj_bf16 = prepare_adjacency(norm_adj, n_pad)        # hoistable across calls
    emb0 = _prepare_embeddings(user_emb, item_emb, n_pad, d_pad)
    return _lightgcn_padded_forward(
        adj_bf16, emb0, num_layers=num_layers, num_users=num_users,
        num_items=num_items, num_nodes=num_nodes, emb_dim=emb_dim,
        tile_m=tm, tile_k=tk)


# ---------------------------------------------------------------------------
# Self-test
# ---------------------------------------------------------------------------
def _xavier_uniform(key, shape):
    fan_out, fan_in = shape
    bound = math.sqrt(6.0 / (fan_in + fan_out))
    return jax.random.uniform(key, shape, jnp.float32, -bound, bound)


def _build_norm_adj(key, num_users, num_items, density=0.15):
    """Dense symmetric-normalized bipartite adjacency D^-1/2 A D^-1/2."""
    n = num_users + num_items
    r = (jax.random.uniform(key, (num_users, num_items)) < density
         ).astype(jnp.float32)
    a = jnp.zeros((n, n), jnp.float32)
    a = a.at[:num_users, num_users:].set(r)
    a = a.at[num_users:, :num_users].set(r.T)
    deg = jnp.clip(a.sum(axis=1), 1.0, None)
    d_inv_sqrt = 1.0 / jnp.sqrt(deg)
    return a * d_inv_sqrt[:, None] * d_inv_sqrt[None, :]


def _reference_forward(norm_adj, user_emb, item_emb, num_layers):
    """Pure-JAX reference with identical bf16 message passing / f32 sums."""
    num_users = user_emb.shape[0]
    all_emb = jnp.concatenate([user_emb, item_emb], axis=0).astype(jnp.float32)
    adj = norm_adj.astype(jnp.bfloat16).astype(jnp.float32)
    e = all_emb
    s = all_emb
    for _ in range(num_layers):
        e = adj @ e.astype(jnp.bfloat16).astype(jnp.float32)
        s = s + e
    final = s / (num_layers + 1)
    return final[:num_users], final[num_users:]


if __name__ == "__main__":
    key = jax.random.PRNGKey(0)
    emb_dim = 32

    # --- Test 1: shipped size -> fused single-call path ---------------------
    num_users, num_items, num_layers = 48, 80, 3          # 128 nodes
    k_u, k_i, k_adj, key = jax.random.split(key, 4)
    user_emb = _xavier_uniform(k_u, (num_users, emb_dim))
    item_emb = _xavier_uniform(k_i, (num_items, emb_dim))
    norm_adj = _build_norm_adj(k_adj, num_users, num_items)

    u_out, i_out = jax.block_until_ready(
        lightgcn_forward(norm_adj, user_emb, item_emb, num_layers))
    u_ref, i_ref = _reference_forward(norm_adj, user_emb, item_emb, num_layers)
    assert u_out.shape == (num_users, emb_dim)
    assert i_out.shape == (num_items, emb_dim)
    assert jnp.allclose(u_out, u_ref, rtol=1e-4, atol=1e-5)
    assert jnp.allclose(i_out, i_ref, rtol=1e-4, atol=1e-5)

    # --- Test 2: exercise the tiled (large-graph) path at a small size ------
    num_users2, num_items2, num_layers2 = 180, 204, 2      # 384 nodes
    k_u, k_i, k_adj, key = jax.random.split(key, 4)
    user_emb2 = _xavier_uniform(k_u, (num_users2, emb_dim))
    item_emb2 = _xavier_uniform(k_i, (num_items2, emb_dim))
    norm_adj2 = _build_norm_adj(k_adj, num_users2, num_items2)

    u_out2, i_out2 = jax.block_until_ready(
        lightgcn_forward(norm_adj2, user_emb2, item_emb2, num_layers2,
                         tile_m=128, tile_k=256))
    u_ref2, i_ref2 = _reference_forward(norm_adj2, user_emb2, item_emb2,
                                        num_layers2)
    assert u_out2.shape == (num_users2, emb_dim)
    assert i_out2.shape == (num_items2, emb_dim)
    assert jnp.allclose(u_out2, u_ref2, rtol=2e-4, atol=2e-5)
    assert jnp.allclose(i_out2, i_ref2, rtol=2e-4, atol=2e-5)

    print("KERNEL_OK")
</pallas_src>

<mosaic_0001>
module attributes {stable_mosaic.version = 11 : i64} {
  func.func @_fused_lightgcn_kernel(%arg0: i32, %arg1: memref<128x128xbf16, #tpu.memory_space<vmem>>, %arg2: memref<128x128xf32, #tpu.memory_space<vmem>>, %arg3: memref<128x128xf32, #tpu.memory_space<vmem>>) attributes {dimension_semantics = [#tpu.dimension_semantics<arbitrary>], iteration_bounds = array<i64: 1>, scalar_prefetch = 0 : i64, scratch_operands = 0 : i64, tpu.core_type = #tpu.core_type<tc>, window_params = [{pipeline_mode = #tpu.pipeline_mode<synchronous>, transform_indices = @transform_0, window_bounds = array<i64: 128, 128>}, {pipeline_mode = #tpu.pipeline_mode<synchronous>, transform_indices = @transform_1, window_bounds = array<i64: 128, 128>}, {pipeline_mode = #tpu.pipeline_mode<synchronous>, transform_indices = @transform_2, window_bounds = array<i64: 128, 128>}]} {
    %c0 = arith.constant 0 : index
    %c0_0 = arith.constant 0 : index
    %0 = vector.load %arg1[%c0, %c0_0] : memref<128x128xbf16, #tpu.memory_space<vmem>>, vector<128x128xbf16>
    %c0_1 = arith.constant 0 : index
    %c0_2 = arith.constant 0 : index
    %1 = vector.load %arg2[%c0_1, %c0_2] : memref<128x128xf32, #tpu.memory_space<vmem>>, vector<128x128xf32>
    %2 = arith.truncf %1 : vector<128x128xf32> to vector<128x128xbf16>
    %cst = arith.constant dense<0.000000e+00> : vector<128x128xf32>
    %3 = tpu.matmul %0, %2, %cst {dimension_numbers = #tpu.dot_dimension_numbers<[1], [0], [0], [1], [0, 0, 1, 1], [], []>} : vector<128x128xbf16>, vector<128x128xbf16>, vector<128x128xf32> -> vector<128x128xf32>
    %4 = arith.addf %1, %3 : vector<128x128xf32>
    %5 = arith.truncf %3 : vector<128x128xf32> to vector<128x128xbf16>
    %cst_3 = arith.constant dense<0.000000e+00> : vector<128x128xf32>
    %6 = tpu.matmul %0, %5, %cst_3 {dimension_numbers = #tpu.dot_dimension_numbers<[1], [0], [0], [1], [0, 0, 1, 1], [], []>} : vector<128x128xbf16>, vector<128x128xbf16>, vector<128x128xf32> -> vector<128x128xf32>
    %7 = arith.addf %4, %6 : vector<128x128xf32>
    %8 = arith.truncf %6 : vector<128x128xf32> to vector<128x128xbf16>
    %cst_4 = arith.constant dense<0.000000e+00> : vector<128x128xf32>
    %9 = tpu.matmul %0, %8, %cst_4 {dimension_numbers = #tpu.dot_dimension_numbers<[1], [0], [0], [1], [0, 0, 1, 1], [], []>} : vector<128x128xbf16>, vector<128x128xbf16>, vector<128x128xf32> -> vector<128x128xf32>
    %10 = arith.addf %7, %9 : vector<128x128xf32>
    %cst_5 = arith.constant 4.000000e+00 : f32
    %11 = vector.broadcast %cst_5 : f32 to vector<128x128xf32>
    %12 = arith.divf %10, %11 : vector<128x128xf32>
    %c0_6 = arith.constant 0 : index
    %c0_7 = arith.constant 0 : index
    %13 = vector.load %arg3[%c0_6, %c0_7] : memref<128x128xf32, #tpu.memory_space<vmem>>, vector<128x128xf32>
    tpu.vector_store %arg3[%c0_6, %c0_7], %12 {strides = array<i32>} : memref<128x128xf32, #tpu.memory_space<vmem>>, vector<128x128xf32>,
    return
  }
  func.func @transform_0(%arg0: i32) -> (i32, i32) {
    %c0_i32 = arith.constant 0 : i32
    %c0_i32_0 = arith.constant 0 : i32
    %c0_i32_1 = arith.constant 0 : i32
    return %c0_i32, %c0_i32_0 : i32, i32
  }
  func.func @transform_1(%arg0: i32) -> (i32, i32) {
    %c0_i32 = arith.constant 0 : i32
    %c0_i32_0 = arith.constant 0 : i32
    %c0_i32_1 = arith.constant 0 : i32
    return %c0_i32, %c0_i32_0 : i32, i32
  }
  func.func @transform_2(%arg0: i32) -> (i32, i32) {
    %c0_i32 = arith.constant 0 : i32
    %c0_i32_0 = arith.constant 0 : i32
    %c0_i32_1 = arith.constant 0 : i32
    return %c0_i32, %c0_i32_0 : i32, i32
  }
}

</mosaic_0001>

<bundles_post_ra>
// kernel: _lightgcn_padded_forward.1
= control target key start
LH: loop header
LB: loop body
LE: loop exit
PB: predicated region body
PF: predicated region fallthrough
CT: control target
= control target key end

     0   :  { %7 = vsyncpa [#allocation3], 0  ;;  %s1001_s0 = inlined_call_operand.hbm [shape: bf16[128,128], index: 0, kind: input, shape index: {}]   ;;  %s1002_s1 = inlined_call_operand.hbm [shape: f32[128,128], index: 1, kind: input, shape index: {}]   ;;  %s1003_s2 = inlined_call_operand.vmem [shape: f32[128,128], index: 2, kind: output, shape index: {}]  }
   0x1   :  { %8 = vsyncpa [#allocation5], 0  ;;  %s752_s9 = smov [#allocation2]   ;;  %s704_s13 = scalar_lea.hbm %s1001_s0, 1024 }
   0x2   :  { %s14_s10 = sshll.u32 %s752_s9, 4  ;;  %p705_p0 = scmp.ne.s32.totalorder %s1001_s0, %s704_s13  ;;  %s15_s10 = int_to_ptr.vmem [resolvable:$true] %s14_s10 }
   0x3   :  { %p708_p1 = scmp.lt.u32.totalorder %s704_s13, %s1001_s0 }
   0x5   :  { %p710_p2 = pnand %p708_p1, %p705_p0 }
   0x7   :  { %713 = shalt.err (!%p710_p2)
}
   0x8   :  { %s714_s18 = scalar_lea.vmem %s15_s10, 1024  ;;  %p719_p4 = scmp.lt.s32.totalorder %s15_s10, %s15_s10 }
   0x9   :  { %p715_p3 = scmp.ne.s32.totalorder %s15_s10, %s714_s18  ;;  %p720_p5 = scmp.lt.s32.totalorder %s714_s18, %s714_s18 }
   0xb   :  { %p721_p6 = por %p720_p5, %p719_p4 }
   0xd   :  { %p722_p7 = pnand %p721_p6, %p715_p3 }
   0xf   :  { %725 = shalt.err (!%p722_p7)
}
  0x10   :  { %s753_s19 = smov 64   ;;  %s754_s20 = smov 4  }
  0x11   :  { %20 = dma.hbm_to_vmem [thread:$0]  %s1001_s0, 1024, %s15_s10, [#allocation3], %s753_s19, %s753_s19, %s754_s20  }
  0x12   :  { %s755_s23 = smov [#allocation4]   ;;  %s726_s27 = scalar_lea.hbm %s1002_s1, 2048 }
  0x13   :  { %s26_s24 = sshll.u32 %s755_s23, 4  ;;  %p727_p8 = scmp.ne.s32.totalorder %s1002_s1, %s726_s27  ;;  %s27_s24 = int_to_ptr.vmem [resolvable:$true] %s26_s24 }
  0x14   :  { %p730_p9 = scmp.lt.u32.totalorder %s726_s27, %s1002_s1 }
  0x16   :  { %p732_p10 = pnand %p730_p9, %p727_p8 }
  0x18   :  { %735 = shalt.err (!%p732_p10)
}
  0x19   :  { %s736_s4 = scalar_lea.vmem %s27_s24, 2048  ;;  %p741_p12 = scmp.lt.s32.totalorder %s27_s24, %s27_s24 }
  0x1a   :  { %p737_p11 = scmp.ne.s32.totalorder %s27_s24, %s736_s4  ;;  %p742_p13 = scmp.lt.s32.totalorder %s736_s4, %s736_s4 }
  0x1c   :  { %p743_p0 = por %p742_p13, %p741_p12 }
  0x1e   :  { %p744_p1 = pnand %p743_p0, %p737_p11 }
  0x20   :  { %747 = shalt.err (!%p744_p1)
}
  0x21   :  { %s756_s0 = smov 128   ;;  %s757_s5 = smov 8  }
  0x22   :  { %32 = dma.hbm_to_vmem [thread:$0]  %s1002_s1, 2048, %s27_s24, [#allocation5], %s756_s0, %s756_s0, %s757_s5  }
  0x23   :  { %748 = dma.done.wait [#allocation3], 1024  }
  0x24   :  { %749 = vsyncadd [#allocation3], 4294966272 }
  0x25   :  { %750 = dma.done.wait [#allocation5], 2048  }
  0x26   :  { %751 = vsyncadd [#allocation5], 4294965248  ;;  %v797_v0 = vld [vmem:[#allocation4] sm:$0xff]  ;;  %v799_v1 = vld [vmem:[#allocation4 + $0x8] sm:$0xff] }
  0x27   :  { %v801_v2 = vld [vmem:[#allocation4 + $0x10] sm:$0xff]  ;;  %v72_v3 = vpack.c.bf16 %v799_v1, %v797_v0  ;;  %v805_v4 = vld [vmem:[#allocation4 + $0x18] sm:$0xff]  ;;  %v809_v6 = vld [vmem:[#allocation4 + $0x20] sm:$0xff] }
  0x28   :  { %v73_v5 = vpack.c.bf16 %v805_v4, %v801_v2  ;;  %v811_v7 = vld [vmem:[#allocation4 + $0x28] sm:$0xff]  ;;  %v813_v8 = vld [vmem:[#allocation4 + $0x30] sm:$0xff]  ;;  %v817_v10 = vld [vmem:[#allocation4 + $0x38] sm:$0xff] }
  0x29   :  { %578 = vmatprep.subr.bf16.mxu0 %v72_v3  ;;  %v74_v9 = vpack.c.bf16 %v811_v7, %v809_v6  ;;  %v696_v11 = vld [vmem:[#allocation2] sm:$0xff]   ;;  %v75_v12 = vpack.c.bf16 %v817_v10, %v813_v8  ;;  %v823_v14 = vld [vmem:[#allocation4 + $0x48] sm:$0xff]  ;;  %v827_v16 = vld [vmem:[#allocation4 + $0x50] sm:$0xff] }
  0x2a   :  { %579 = vmatpush3.bf16.msra.mxu0 %v72_v3  ;;  %594 = vmatprep.mubr.bf16.mxu0 %v696_v11  ;;  %v821_v13 = vld [vmem:[#allocation4 + $0x40] sm:$0xff]  ;;  %v829_v17 = vld [vmem:[#allocation4 + $0x58] sm:$0xff]  ;;  %v835_v20 = vld [vmem:[#allocation4 + $0x68] sm:$0xff] }
  0x2b   :  { %580 = vmatprep.subr.bf16.mxu0 %v73_v5  ;;  %626 = vmatprep.mubr.bf16.mxu1 %v696_v11  ;;  %v76_v15 = vpack.c.bf16 %v823_v14, %v821_v13  ;;  %v77_v18 = vpack.c.bf16 %v829_v17, %v827_v16  ;;  %v833_v19 = vld [vmem:[#allocation4 + $0x60] sm:$0xff]  ;;  %v839_v22 = vld [vmem:[#allocation4 + $0x70] sm:$0xff]  ;;  %v841_v23 = vld [vmem:[#allocation4 + $0x78] sm:$0xff] }
  0x2c   :  { %v78_v21 = vpack.c.bf16 %v835_v20, %v833_v19  ;;  %v79_v24 = vpack.c.bf16 %v841_v23, %v839_v22  ;;  %v845_v25 = vld [vmem:[#allocation2 + $0x8] sm:$0xff]   ;;  %v847_v26 = vld [vmem:[#allocation2 + $0x10] sm:$0xff]   ;;  %v851_v27 = vld [vmem:[#allocation2 + $0x18] sm:$0xff]  }
  0x2d   :  { %v700_v28 = vld [vmem:[#allocation2 + $0x20] sm:$0xff]   ;;  %v854_v29 = vld [vmem:[#allocation2 + $0x28] sm:$0xff]   ;;  %v856_v30 = vld [vmem:[#allocation2 + $0x30] sm:$0xff]  }
  0x2e   :  { %581 = vmatpush3.bf16.msra.mxu0 %v73_v5  ;;  %v860_v31 = vld [vmem:[#allocation2 + $0x38] sm:$0xff]  }
  0x2f   :  { %582 = vmatprep.subr.bf16.mxu0 %v74_v9 }
  0x32   :  { %583 = vmatpush3.bf16.msra.mxu0 %v74_v9 }
  0x33   :  { %584 = vmatprep.subr.bf16.mxu0 %v75_v12 }
  0x36   :  { %585 = vmatpush3.bf16.msra.mxu0 %v75_v12 }
  0x37   :  { %586 = vmatprep.subr.bf16.mxu0 %v76_v15 }
  0x3a   :  { %587 = vmatpush3.bf16.msra.mxu0 %v76_v15 }
  0x3b   :  { %588 = vmatprep.subr.bf16.mxu0 %v77_v18 }
  0x3e   :  { %589 = vmatpush3.bf16.msra.mxu0 %v77_v18 }
  0x3f   :  { %590 = vmatprep.subr.bf16.mxu0 %v78_v21 }
  0x42   :  { %591 = vmatpush3.bf16.msra.mxu0 %v78_v21 }
  0x43   :  { %592 = vmatprep.subr.bf16.mxu0 %v79_v24 }
  0x46   :  { %593 = vmatpush3.bf16.msra.mxu0 %v79_v24 }
  0x49   :  { %595 = vmatmul.mubr.bf16.vlgmr.msra.gmra.mrb[0].mxu0 %v845_v25 }
  0x4a   :  { %598 = vmatprep.mubr.bf16.mxu0 %v847_v26 }
  0x51   :  { %599 = vmatmul.mubr.bf16.gmra.mrb[4].mxu0 %v851_v27 }
  0x52   :  { %602 = vmatprep.mubr.bf16.mxu0 %v700_v28 }
  0x59   :  { %603 = vmatmul.mubr.bf16.gmra.mrb[8].mxu0 %v854_v29 }
  0x5a   :  { %606 = vmatprep.mubr.bf16.mxu0 %v856_v30 }
  0x61   :  { %607 = vmatmul.mubr.bf16.gmra.mrb[12].mxu0 %v860_v31 }
  0x62   :  { %658 = vmatprep.mubr.bf16.mxu0 %v696_v11 }
 0x11c   :  { %v596_v32 = vpop.f32.mrb[0].mxu0 }
 0x11d   :  { %v162_v33 = vpop.f32.mrb[1].mxu0  ;;  %v227_v56 = vadd.f32 %v596_v32, %v801_v2 }
 0x11e   :  { %v597_v34 = vpop.f32.mrb[2].mxu0  ;;  %v225_v57 = vadd.f32 %v162_v33, %v797_v0 }
 0x11f   :  { %v242_v35 = vpack.c.bf16 %v597_v34, %v596_v32  ;;  %v165_v36 = vpop.f32.mrb[3].mxu0  ;;  %v228_v59 = vadd.f32 %v597_v34, %v805_v4 }
 0x120   :  { %v241_v37 = vpack.c.bf16 %v165_v36, %v162_v33  ;;  %v226_v62 = vadd.f32 %v165_v36, %v799_v1 }
 0x122   :  { %610 = vmatprep.subr.bf16.mxu1 %v241_v37 }
 0x123   :  { %611 = vmatpush3.bf16.msra.mxu1 %v241_v37 }
 0x124   :  { %v600_v38 = vpop.f32.mrb[4].mxu0  ;;  %612 = vmatprep.subr.bf16.mxu1 %v242_v35 }
 0x125   :  { %v178_v39 = vpop.f32.mrb[5].mxu0  ;;  %v231_v0 = vadd.f32 %v600_v38, %v813_v8 }
 0x126   :  { %v601_v40 = vpop.f32.mrb[6].mxu0  ;;  %v229_v4 = vadd.f32 %v178_v39, %v809_v6 }
 0x127   :  { %v244_v41 = vpack.c.bf16 %v601_v40, %v600_v38  ;;  %v181_v42 = vpop.f32.mrb[7].mxu0  ;;  %613 = vmatpush3.bf16.msra.mxu1 %v242_v35  ;;  %v232_v1 = vadd.f32 %v601_v40, %v817_v10 }
 0x128   :  { %v243_v43 = vpack.c.bf16 %v181_v42, %v178_v39  ;;  %v230_v24 = vadd.f32 %v181_v42, %v811_v7 }
 0x12a   :  { %614 = vmatprep.subr.bf16.mxu1 %v243_v43 }
 0x12b   :  { %615 = vmatpush3.bf16.msra.mxu1 %v243_v43 }
 0x12c   :  { %v863_v44 = vpop.f32.mrb[8].mxu0  ;;  %616 = vmatprep.subr.bf16.mxu1 %v244_v41 }
 0x12d   :  { %v865_v45 = vpop.f32.mrb[9].mxu0  ;;  %v235_v10 = vadd.f32 %v863_v44, %v827_v16 }
 0x12e   :  { %v867_v46 = vpop.f32.mrb[10].mxu0  ;;  %v233_v7 = vadd.f32 %v865_v45, %v821_v13 }
 0x12f   :  { %v246_v47 = vpack.c.bf16 %v867_v46, %v863_v44  ;;  %v871_v48 = vpop.f32.mrb[11].mxu0  ;;  %617 = vmatpush3.bf16.msra.mxu1 %v244_v41  ;;  %v236_v37 = vadd.f32 %v867_v46, %v829_v17 }
 0x130   :  { %v245_v49 = vpack.c.bf16 %v871_v48, %v865_v45  ;;  %v234_v40 = vadd.f32 %v871_v48, %v823_v14 }
 0x132   :  { %618 = vmatprep.subr.bf16.mxu1 %v245_v49 }
 0x133   :  { %619 = vmatpush3.bf16.msra.mxu1 %v245_v49 }
 0x134   :  { %v875_v50 = vpop.f32.mrb[12].mxu0  ;;  %620 = vmatprep.subr.bf16.mxu1 %v246_v47 }
 0x135   :  { %v877_v51 = vpop.f32.mrb[13].mxu0  ;;  %v239_v45 = vadd.f32 %v875_v50, %v839_v22 }
 0x136   :  { %v879_v52 = vpop.f32.mrb[14].mxu0  ;;  %v237_v17 = vadd.f32 %v877_v51, %v833_v19 }
 0x137   :  { %v248_v53 = vpack.c.bf16 %v879_v52, %v875_v50  ;;  %v883_v54 = vpop.f32.mrb[15].mxu0  ;;  %621 = vmatpush3.bf16.msra.mxu1 %v246_v47  ;;  %v240_v46 = vadd.f32 %v879_v52, %v841_v23 }
 0x138   :  { %v247_v55 = vpack.c.bf16 %v883_v54, %v877_v51 }
 0x13a   :  { %622 = vmatprep.subr.bf16.mxu1 %v247_v55 }
 0x13b   :  { %623 = vmatpush3.bf16.msra.mxu1 %v247_v55 }
 0x13c   :  { %624 = vmatprep.subr.bf16.mxu1 %v248_v53 }
 0x13f   :  { %625 = vmatpush3.bf16.msra.mxu1 %v248_v53  ;;  %v238_v53 = vadd.f32 %v883_v54, %v835_v20 }
 0x142   :  { %627 = vmatmul.mubr.bf16.vlgmr.msra.gmra.mrb[0].mxu1 %v845_v25 }
 0x143   :  { %630 = vmatprep.mubr.bf16.mxu1 %v847_v26 }
 0x14a   :  { %631 = vmatmul.mubr.bf16.gmra.mrb[4].mxu1 %v851_v27 }
 0x14b   :  { %634 = vmatprep.mubr.bf16.mxu1 %v700_v28 }
 0x152   :  { %635 = vmatmul.mubr.bf16.gmra.mrb[8].mxu1 %v854_v29 }
 0x153   :  { %638 = vmatprep.mubr.bf16.mxu1 %v856_v30 }
 0x15a   :  { %639 = vmatmul.mubr.bf16.gmra.mrb[12].mxu1 %v860_v31 }
 0x15b   :  { %666 = vmatprep.mubr.bf16.mxu1 %v700_v28 }
 0x215   :  { %v628_v58 = vpop.f32.mrb[0].mxu1 }
 0x216   :  { %v896_v60 = vadd.f32 %v628_v58, %v227_v56  ;;  %v283_v61 = vpop.f32.mrb[1].mxu1 }
 0x217   :  { %v899_v63 = vadd.f32 %v283_v61, %v225_v57  ;;  %v629_v3 = vpop.f32.mrb[2].mxu1 }
 0x218   :  { %v901_v5 = vadd.f32 %v629_v3, %v228_v59  ;;  %v363_v9 = vpack.c.bf16 %v629_v3, %v628_v58  ;;  %v286_v11 = vpop.f32.mrb[3].mxu1 }
 0x219   :  { %v903_v12 = vadd.f32 %v286_v11, %v226_v62  ;;  %v362_v2 = vpack.c.bf16 %v286_v11, %v283_v61 }
 0x21b   :  { %642 = vmatprep.subr.bf16.mxu0 %v362_v2  ;;  %674 = vmatprep.subr.bf16.mxu1 %v362_v2 }
 0x21c   :  { %643 = vmatpush3.bf16.msra.mxu0 %v362_v2  ;;  %682 = vmatpush3.bf16.msra.mxu1 %v362_v2 }
 0x21d   :  { %v632_v15 = vpop.f32.mrb[4].mxu1  ;;  %644 = vmatprep.subr.bf16.mxu0 %v363_v9  ;;  %675 = vmatprep.subr.bf16.mxu1 %v363_v9 }
 0x21e   :  { %v908_v18 = vadd.f32 %v632_v15, %v231_v0  ;;  %v299_v21 = vpop.f32.mrb[5].mxu1 }
 0x21f   :  { %v911_v28 = vadd.f32 %v299_v21, %v229_v4  ;;  %v633_v32 = vpop.f32.mrb[6].mxu1 }
 0x220   :  { %v913_v33 = vadd.f32 %v633_v32, %v232_v1  ;;  %v365_v8 = vpack.c.bf16 %v633_v32, %v632_v15  ;;  %v302_v34 = vpop.f32.mrb[7].mxu1  ;;  %645 = vmatpush3.bf16.msra.mxu0 %v363_v9  ;;  %683 = vmatpush3.bf16.msra.mxu1 %v363_v9 }
 0x221   :  { %v915_v6 = vadd.f32 %v302_v34, %v230_v24  ;;  %v364_v35 = vpack.c.bf16 %v302_v34, %v299_v21 }
 0x223   :  { %646 = vmatprep.subr.bf16.mxu0 %v364_v35  ;;  %676 = vmatprep.subr.bf16.mxu1 %v364_v35 }
 0x224   :  { %647 = vmatpush3.bf16.msra.mxu0 %v364_v35  ;;  %684 = vmatpush3.bf16.msra.mxu1 %v364_v35 }
 0x225   :  { %v636_v36 = vpop.f32.mrb[8].mxu1  ;;  %648 = vmatprep.subr.bf16.mxu0 %v365_v8  ;;  %677 = vmatprep.subr.bf16.mxu1 %v365_v8 }
 0x226   :  { %v356_v38 = vadd.f32 %v636_v36, %v235_v10  ;;  %v315_v39 = vpop.f32.mrb[9].mxu1 }
 0x227   :  { %v354_v41 = vadd.f32 %v315_v39, %v233_v7  ;;  %v637_v42 = vpop.f32.mrb[10].mxu1 }
 0x228   :  { %v357_v43 = vadd.f32 %v637_v42, %v236_v37  ;;  %v367_v16 = vpack.c.bf16 %v637_v42, %v636_v36  ;;  %v318_v44 = vpop.f32.mrb[11].mxu1  ;;  %649 = vmatpush3.bf16.msra.mxu0 %v365_v8  ;;  %685 = vmatpush3.bf16.msra.mxu1 %v365_v8 }
 0x229   :  { %v355_v47 = vadd.f32 %v318_v44, %v234_v40  ;;  %v366_v13 = vpack.c.bf16 %v318_v44, %v315_v39 }
 0x22b   :  { %650 = vmatprep.subr.bf16.mxu0 %v366_v13  ;;  %678 = vmatprep.subr.bf16.mxu1 %v366_v13 }
 0x22c   :  { %651 = vmatpush3.bf16.msra.mxu0 %v366_v13  ;;  %686 = vmatpush3.bf16.msra.mxu1 %v366_v13 }
 0x22d   :  { %v640_v14 = vpop.f32.mrb[12].mxu1  ;;  %652 = vmatprep.subr.bf16.mxu0 %v367_v16  ;;  %679 = vmatprep.subr.bf16.mxu1 %v367_v16 }
 0x22e   :  { %v360_v48 = vadd.f32 %v640_v14, %v239_v45  ;;  %v331_v49 = vpop.f32.mrb[13].mxu1 }
 0x22f   :  { %v358_v55 = vadd.f32 %v331_v49, %v237_v17  ;;  %v641_v56 = vpop.f32.mrb[14].mxu1 }
 0x230   :  { %v933_v57 = vadd.f32 %v641_v56, %v240_v46  ;;  %v369_v22 = vpack.c.bf16 %v641_v56, %v640_v14  ;;  %v334_v50 = vpop.f32.mrb[15].mxu1  ;;  %653 = vmatpush3.bf16.msra.mxu0 %v367_v16  ;;  %687 = vmatpush3.bf16.msra.mxu1 %v367_v16 }
 0x231   :  { %v935_v19 = vadd.f32 %v334_v50, %v238_v53  ;;  %v368_v51 = vpack.c.bf16 %v334_v50, %v331_v49 }
 0x233   :  { %654 = vmatprep.subr.bf16.mxu0 %v368_v51  ;;  %680 = vmatprep.subr.bf16.mxu1 %v368_v51 }
 0x234   :  { %655 = vmatpush3.bf16.msra.mxu0 %v368_v51  ;;  %688 = vmatpush3.bf16.msra.mxu1 %v368_v51 }
 0x235   :  { %656 = vmatprep.subr.bf16.mxu0 %v369_v22  ;;  %681 = vmatprep.subr.bf16.mxu1 %v369_v22 }
 0x238   :  { %657 = vmatpush3.bf16.msra.mxu0 %v369_v22  ;;  %689 = vmatpush3.bf16.msra.mxu1 %v369_v22 }
 0x23b   :  { %659 = vmatmul.mubr.bf16.vlgmr.msra.gmra.mrb[16].mxu0 %v845_v25  ;;  %667 = vmatmul.mubr.bf16.vlgmr.msra.gmra.mrb[16].mxu1 %v854_v29 }
 0x23c   :  { %662 = vmatprep.mubr.bf16.mxu0 %v847_v26  ;;  %670 = vmatprep.mubr.bf16.mxu1 %v856_v30 }
 0x243   :  { %663 = vmatmul.mubr.bf16.gmra.mrb[20].mxu0 %v851_v27  ;;  %671 = vmatmul.mubr.bf16.gmra.mrb[20].mxu1 %v860_v31 }
 0x30e   :  { %v660_v20 = vpop.f32.mrb[16].mxu0  ;;  %v668_v23 = vpop.f32.mrb[16].mxu1 }
 0x30f   :  { %v469_v52 = vadd.f32 %v660_v20, %v896_v60  ;;  %v477_v54 = vadd.f32 %v668_v23, %v356_v38  ;;  %v404_v58 = vpop.f32.mrb[17].mxu0  ;;  %v436_v59 = vpop.f32.mrb[17].mxu1 }
 0x310   :  { %v467_v61 = vadd.f32 %v404_v58, %v899_v63  ;;  %v475_v25 = vadd.f32 %v436_v59, %v354_v41  ;;  %v661_v62 = vpop.f32.mrb[18].mxu0  ;;  %v669_v29 = vpop.f32.mrb[18].mxu1 }
 0x311   :  { %v486_v3 = vmul.f32 0.25, %v469_v52  ;;  %v494_v26 = vmul.f32 0.25, %v477_v54  ;;  %v470_v30 = vadd.f32 %v661_v62, %v901_v5  ;;  %v478_v9 = vadd.f32 %v669_v29, %v357_v43  ;;  %v407_v27 = vpop.f32.mrb[19].mxu0  ;;  %v439_v11 = vpop.f32.mrb[19].mxu1 }
 0x312   :  { %v484_v31 = vmul.f32 0.25, %v467_v61  ;;  %v492_v2 = vmul.f32 0.25, %v475_v25  ;;  %v468_v0 = vadd.f32 %v407_v27, %v903_v12  ;;  %v476_v60 = vadd.f32 %v439_v11, %v355_v47 }
 0x313   :  { %502 = vst [vmem:[%s1003_s2 + $0x10] sm:$0xff] %v486_v3  ;;  %510 = vst [vmem:[%s1003_s2 + $0x50] sm:$0xff] %v494_v26  ;;  %v487_v63 = vmul.f32 0.25, %v470_v30  ;;  %v495_v4 = vmul.f32 0.25, %v478_v9 }
 0x314   :  { %500 = vst [vmem:[%s1003_s2] sm:$0xff] %v484_v31  ;;  %508 = vst [vmem:[%s1003_s2 + $0x40] sm:$0xff] %v492_v2  ;;  %v485_v5 = vmul.f32 0.25, %v468_v0  ;;  %v493_v12 = vmul.f32 0.25, %v476_v60 }
 0x315   :  { %503 = vst [vmem:[%s1003_s2 + $0x18] sm:$0xff] %v487_v63  ;;  %511 = vst [vmem:[%s1003_s2 + $0x58] sm:$0xff] %v495_v4 }
 0x316   :  { %501 = vst [vmem:[%s1003_s2 + $0x8] sm:$0xff] %v485_v5  ;;  %509 = vst [vmem:[%s1003_s2 + $0x48] sm:$0xff] %v493_v12  ;;  %v664_v15 = vpop.f32.mrb[20].mxu0  ;;  %v672_v1 = vpop.f32.mrb[20].mxu1 }
 0x317   :  { %v473_v21 = vadd.f32 %v664_v15, %v908_v18  ;;  %v481_v24 = vadd.f32 %v672_v1, %v360_v48  ;;  %v420_v32 = vpop.f32.mrb[21].mxu0  ;;  %v452_v8 = vpop.f32.mrb[21].mxu1 }
 0x318   :  { %v471_v34 = vadd.f32 %v420_v32, %v911_v28  ;;  %v479_v35 = vadd.f32 %v452_v8, %v358_v55  ;;  %v665_v10 = vpop.f32.mrb[22].mxu0  ;;  %v673_v7 = vpop.f32.mrb[22].mxu1 }
 0x319   :  { %v490_v36 = vmul.f32 0.25, %v473_v21  ;;  %v498_v37 = vmul.f32 0.25, %v481_v24  ;;  %v474_v38 = vadd.f32 %v665_v10, %v913_v33  ;;  %v482_v39 = vadd.f32 %v673_v7, %v933_v57  ;;  %v423_v40 = vpop.f32.mrb[23].mxu0  ;;  %v455_v41 = vpop.f32.mrb[23].mxu1 }
 0x31a   :  { %v488_v42 = vmul.f32 0.25, %v471_v34  ;;  %v496_v43 = vmul.f32 0.25, %v479_v35  ;;  %v472_v18 = vadd.f32 %v423_v40, %v915_v6  ;;  %v480_v16 = vadd.f32 %v455_v41, %v935_v19 }
 0x31b   :  { %506 = vst [vmem:[%s1003_s2 + $0x30] sm:$0xff] %v490_v36  ;;  %514 = vst [vmem:[%s1003_s2 + $0x70] sm:$0xff] %v498_v37  ;;  %v491_v28 = vmul.f32 0.25, %v474_v38  ;;  %v499_v33 = vmul.f32 0.25, %v482_v39 }
 0x31c   :  { %504 = vst [vmem:[%s1003_s2 + $0x20] sm:$0xff] %v488_v42  ;;  %512 = vst [vmem:[%s1003_s2 + $0x60] sm:$0xff] %v496_v43  ;;  %v489_v6 = vmul.f32 0.25, %v472_v18  ;;  %v497_v44 = vmul.f32 0.25, %v480_v16 }
 0x31d   :  { %507 = vst [vmem:[%s1003_s2 + $0x38] sm:$0xff] %v491_v28  ;;  %515 = vst [vmem:[%s1003_s2 + $0x78] sm:$0xff] %v499_v33 }
 0x31e   :  { %505 = vst [vmem:[%s1003_s2 + $0x28] sm:$0xff] %v489_v6  ;;  %513 = vst [vmem:[%s1003_s2 + $0x68] sm:$0xff] %v497_v44 }
 0x31f   :  { %520 = vsyncpa [#allocation3], 1 }
 0x320   :  { %521 = vsyncpa [#allocation5], 1 }

</bundles_post_ra>
